<compile_context>
chip_gen: v6e
topology: v6e:2x2x1
jax: 0.10.0
libtpu: 0.0.40
codegen_flags: <defaults>
</compile_context>

<pallas_src>
import functools
import numpy as np
import jax
import jax.numpy as jnp
from jax import lax
from jax.experimental import pallas as pl
from jax.experimental.pallas import tpu as pltpu

NEG_SLOPE = 0.01   # nn.LeakyReLU() default negative_slope
BN_EPS = 1e-5      # nn.BatchNorm2d default eps


@functools.lru_cache(maxsize=None)
def _roll_sign():
    """Probe the hardware roll convention once.

    Returns +1 if pltpu.roll matches np.roll (out[i] = in[(i - shift) % n]),
    -1 if it rotates the other way.  Keeps the conv tap pairing correct
    regardless of the convention of the installed JAX/Mosaic version.
    """
    def probe(x_ref, o_ref):
        o_ref[...] = pltpu.roll(x_ref[...], 1, axis=1)

    x = jnp.asarray(np.tile(np.arange(128, dtype=np.float32), (8, 1)))
    out = pl.pallas_call(
        probe, out_shape=jax.ShapeDtypeStruct((8, 128), jnp.float32))(x)
    v = float(out[0, 0])
    if v == 127.0:
        return 1
    if v == 1.0:
        return -1
    raise RuntimeError(f"unexpected pltpu.roll convention (probe got {v})")


def _resnet_block_kernel(x_ref, maskp_ref, w1_ref, t1_ref, w2_ref, t2_ref,
                         out_ref, slab_ref, *,
                         row_rolls_img, row_rolls_cat, col_rolls):
    """B images per grid step, lane-concatenated.

    x_ref    : (B, C, Lp)    zero/row-padded, flattened inputs
    maskp_ref: (1, B*Lp)     1.0 at real pixel positions, 0.0 at padding
    w*_ref   : (3, F, 3*C)   weights grouped by dw; K ordered (dh, c);
                             BN scale folded in
    t*_ref   : (F, 1)        folded BatchNorm shift (conv bias folded in)
    out_ref  : (B, F, Lp)    lane-dense output (real pixels cut in wrapper)
    slab_ref : (3*C, B*Lp)   row-shift im2col scratch, reused by both convs
    *_rolls  : static XLU lane-rotation amounts (built with _roll_sign())
    """
    B, C, Lp = x_ref.shape

    def leaky(v):
        # equivalent to where(v > 0, v, slope*v) for 0 < slope < 1
        return jnp.maximum(v, NEG_SLOPE * v)

    def conv(w_ref):
        # Three K=3C matmuls (one per column tap dw); each (F, B*Lp) result
        # is lane-rolled into place on the XLU and accumulated.
        acc = None
        for dw in range(3):
            part = jnp.dot(w_ref[dw], slab_ref[...],
                           preferred_element_type=jnp.float32)
            if col_rolls[dw] != 0:
                part = pltpu.roll(part, col_rolls[dw], axis=1)
            acc = part if acc is None else acc + part
        return acc

    # conv1 slab: per-image row-shifted copies of the padded input.
    for b in range(B):
        src = x_ref[b]
        for r in range(3):
            amt = row_rolls_img[r]
            shifted = src if amt == 0 else pltpu.roll(src, amt, axis=1)
            slab_ref[r * C:(r + 1) * C, b * Lp:(b + 1) * Lp] = shifted

    # conv1 (+ folded BN1) + LeakyReLU; single mask multiply re-zeroes every
    # padding position so conv2 sees zeros at halo / row-pad / tail lanes.
    h = leaky(conv(w1_ref) + t1_ref[...]) * maskp_ref[...]

    # conv2 slab: row-shifted copies of the already lane-concatenated
    # intermediate.  Rolling across image boundaries is safe: reads feeding
    # valid output positions never leave the owning image's Lp segment.
    for r in range(3):
        amt = row_rolls_cat[r]
        shifted = h if amt == 0 else pltpu.roll(h, amt, axis=1)
        slab_ref[r * C:(r + 1) * C, :] = shifted

    # conv2 (+ folded BN2) + residual + LeakyReLU.  The input is re-read from
    # its VMEM ref here instead of being held live across both convs.
    y = conv(w2_ref) + t2_ref[...]
    for b in range(B):
        out_ref[b] = leaky(y[:, b * Lp:(b + 1) * Lp] + x_ref[b])


def resnet_block_forward(x_nchw, params, imgs_per_step=None):
    N, C, H, W = x_nchw.shape
    F = params["w1"].shape[-1]
    assert C == F, "residual add requires input_features == nb_features"

    Wp = W + 2                                   # one zero column per row side
    L = H * Wp                                   # row-padded flattened length
    HALO = Wp + 1                                # largest |tap offset| of a 3x3
    Lp = ((L + 2 * HALO + 127) // 128) * 128     # lane-dense padded length
    PAD_L = HALO

    # Images per grid step: fatten the matmul N dimension / amortize per-step
    # overhead and weight pushes, but keep >= 2 grid steps when possible so
    # v7x's two TensorCores both get work.
    if imgs_per_step is None:
        B = max(1, min(N, 2048 // Lp))
        while B > 1 and (N % B != 0 or N // B < 2):
            B -= 1
    else:
        B = imgs_per_step
    assert N % B == 0
    G = N // B

    # NCHW -> row-padded -> flattened -> halo-padded: (N, C, Lp).
    # Channels land on sublanes, the spatial axis on lanes; no transpose needed.
    x_rp = jnp.pad(x_nchw, ((0, 0), (0, 0), (0, 0), (1, 1)))        # (N,C,H,Wp)
    x_flat = x_rp.reshape(N, C, L)
    xzp = jnp.pad(x_flat, ((0, 0), (0, 0), (PAD_L, Lp - L - PAD_L)))

    # mask of real pixel positions on the padded flattened spatial axis,
    # tiled across the B lane-concatenated images of one grid step
    cols = np.arange(L) % Wp
    m = np.zeros((Lp,), np.float32)
    m[PAD_L:PAD_L + L] = ((cols >= 1) & (cols <= W)).astype(np.float32)
    maskp = jnp.asarray(np.tile(m, B)[None, :])                      # (1, B*Lp)

    # Static lane-rotation amounts.  Desired np.roll shifts:
    #   slab row-shift r (dh):  -(r-1)*Wp       (per-image axis length Lp,
    #                                            concatenated length B*Lp)
    #   result col-shift dw:    -(dw-1)         (concatenated length B*Lp)
    sign = _roll_sign()
    row_rolls_img = tuple((sign * (-(r - 1) * Wp)) % Lp for r in range(3))
    row_rolls_cat = tuple((sign * (-(r - 1) * Wp)) % (B * Lp) for r in range(3))
    col_rolls = tuple((sign * (-(dw - 1))) % (B * Lp) for dw in range(3))

    def fold(w_hwio, conv_b, g, b, mu, var):
        scale = g / jnp.sqrt(var + BN_EPS)                 # (F,)
        shift = b + scale * (conv_b - mu)                  # conv bias folded in
        # (dh, dw, cin, F) -> (dw, F, dh, cin) -> (3, F, 3C), BN scale folded
        w = jnp.transpose(w_hwio, (1, 3, 0, 2)).reshape(3, F, 3 * C)
        w = w * scale[None, :, None]
        return w, shift.reshape(F, 1)

    w1m, t1 = fold(params["w1"], params["cb1"], params["g1"],
                   params["b1"], params["m1"], params["v1"])
    w2m, t2 = fold(params["w2"], params["cb2"], params["g2"],
                   params["b2"], params["m2"], params["v2"])

    kernel = functools.partial(_resnet_block_kernel,
                               row_rolls_img=row_rolls_img,
                               row_rolls_cat=row_rolls_cat,
                               col_rolls=col_rolls)

    out_flat = pl.pallas_call(
        kernel,
        out_shape=jax.ShapeDtypeStruct((N, F, Lp), jnp.float32),
        grid=(G,),
        in_specs=[
            pl.BlockSpec((B, C, Lp), lambda g: (g, 0, 0)),
            pl.BlockSpec((1, B * Lp), lambda g: (0, 0)),
            pl.BlockSpec((3, F, 3 * C), lambda g: (0, 0, 0)),
            pl.BlockSpec((F, 1), lambda g: (0, 0)),
            pl.BlockSpec((3, F, 3 * C), lambda g: (0, 0, 0)),
            pl.BlockSpec((F, 1), lambda g: (0, 0)),
        ],
        out_specs=pl.BlockSpec((B, F, Lp), lambda g: (g, 0, 0)),
        scratch_shapes=[pltpu.VMEM((3 * C, B * Lp), jnp.float32)],
        compiler_params=pltpu.CompilerParams(dimension_semantics=("parallel",)),
    )(xzp, maskp, w1m, t1, w2m, t2)

    # strip halo + row-pad columns: (N, F, Lp) -> NCHW
    out = out_flat[:, :, PAD_L:PAD_L + L].reshape(N, F, H, Wp)
    return out[:, :, :, 1:W + 1]


def resnet_block_reference(x, params):
    """Pure-JAX NCHW reference matching the PyTorch forward (inference-mode BN)."""
    def conv(inp, w_hwio, b):
        w_oihw = jnp.transpose(w_hwio, (3, 2, 0, 1))
        y = lax.conv_general_dilated(inp, w_oihw, (1, 1), ((1, 1), (1, 1)),
                                     dimension_numbers=("NCHW", "OIHW", "NCHW"))
        return y + b[None, :, None, None]

    def bn(inp, g, b, m, v):
        scale = g / jnp.sqrt(v + BN_EPS)
        return inp * scale[None, :, None, None] + (b - m * scale)[None, :, None, None]

    def leaky(v):
        return jnp.where(v > 0, v, NEG_SLOPE * v)

    h = leaky(bn(conv(x, params["w1"], params["cb1"]),
                 params["g1"], params["b1"], params["m1"], params["v1"]))
    y = bn(conv(h, params["w2"], params["cb2"]),
           params["g2"], params["b2"], params["m2"], params["v2"])
    return leaky(y + x)


if __name__ == "__main__":
    # input_features == nb_features == 32 (required by the residual add);
    # N=4 so the wrapper packs 2 images per grid step and keeps 2 grid steps.
    N, C, H, W = 4, 32, 16, 16
    F = 32

    keys = jax.random.split(jax.random.PRNGKey(0), 13)
    params = {
        "w1": 0.1 * jax.random.normal(keys[0], (3, 3, C, F), jnp.float32),
        "cb1": 0.1 * jax.random.normal(keys[1], (F,), jnp.float32),
        "g1": 1.0 + 0.1 * jax.random.normal(keys[2], (F,), jnp.float32),
        "b1": 0.1 * jax.random.normal(keys[3], (F,), jnp.float32),
        "m1": 0.1 * jax.random.normal(keys[4], (F,), jnp.float32),
        "v1": 0.5 + jnp.abs(jax.random.normal(keys[5], (F,), jnp.float32)),
        "w2": 0.1 * jax.random.normal(keys[6], (3, 3, F, F), jnp.float32),
        "cb2": 0.1 * jax.random.normal(keys[7], (F,), jnp.float32),
        "g2": 1.0 + 0.1 * jax.random.normal(keys[8], (F,), jnp.float32),
        "b2": 0.1 * jax.random.normal(keys[9], (F,), jnp.float32),
        "m2": 0.1 * jax.random.normal(keys[10], (F,), jnp.float32),
        "v2": 0.5 + jnp.abs(jax.random.normal(keys[11], (F,), jnp.float32)),
    }
    x = jax.random.normal(keys[12], (N, C, H, W), jnp.float32)

    out = jax.block_until_ready(resnet_block_forward(x, params))
    ref = jax.block_until_ready(resnet_block_reference(x, params))

    assert out.shape == x.shape
    np.testing.assert_allclose(np.asarray(out), np.asarray(ref),
                               rtol=1e-4, atol=1e-4)
    print("KERNEL_OK")
</pallas_src>

<mosaic_0001>
module attributes {stable_mosaic.version = 11 : i64} {
  func.func @probe(%arg0: memref<8x128xf32, #tpu.memory_space<vmem>>, %arg1: memref<8x128xf32, #tpu.memory_space<vmem>>) attributes {dimension_semantics = [], scalar_prefetch = 0 : i64, scratch_operands = 0 : i64, tpu.core_type = #tpu.core_type<tc>} {
    %c0 = arith.constant 0 : index
    %c0_0 = arith.constant 0 : index
    %0 = vector.load %arg0[%c0, %c0_0] : memref<8x128xf32, #tpu.memory_space<vmem>>, vector<8x128xf32>
    %c1_i32 = arith.constant 1 : i32
    %1 = tpu.dynamic_rotate %0 by %c1_i32 dim 1 : vector<8x128xf32>, i32 -> vector<8x128xf32>
    %c0_1 = arith.constant 0 : index
    %c0_2 = arith.constant 0 : index
    %2 = vector.load %arg1[%c0_1, %c0_2] : memref<8x128xf32, #tpu.memory_space<vmem>>, vector<8x128xf32>
    tpu.vector_store %arg1[%c0_1, %c0_2], %1 {strides = array<i32>} : memref<8x128xf32, #tpu.memory_space<vmem>>, vector<8x128xf32>,
    return
  }
}

</mosaic_0001>

<bundles_post_ra>
// kernel: tpu_custom_call.1
= control target key start
LH: loop header
LB: loop body
LE: loop exit
PB: predicated region body
PF: predicated region fallthrough
CT: control target
= control target key end

     0   :  { %6 = vsyncpa [#allocation3], 0  ;;  %s106_s0 = inlined_call_operand.hbm [shape: f32[8,128], index: 0, kind: input, shape index: {}]   ;;  %s107_s1 = inlined_call_operand.hbm [shape: f32[8,128], index: 1, kind: output, shape index: {}]  }
   0x1   :  { %7 = vsyncpa [#allocation4], 0  ;;  %s87_s6 = smov [#allocation2]  }
   0x2   :  { %s14_s7 = sshll.u32 %s87_s6, 4  ;;  %s15_s7 = int_to_ptr.vmem [resolvable:$true] %s14_s7 }
   0x3   :  { %s51_s8 = scalar_lea.vmem %s15_s7, 128  ;;  %p56_p1 = scmp.lt.s32.totalorder %s15_s7, %s15_s7 }
   0x4   :  { %p52_p0 = scmp.ne.s32.totalorder %s15_s7, %s51_s8  ;;  %p57_p2 = scmp.lt.s32.totalorder %s51_s8, %s51_s8 }
   0x6   :  { %p58_p3 = por %p57_p2, %p56_p1 }
   0x8   :  { %p59_p4 = pnand %p58_p3, %p52_p0 }
   0xa   :  { %62 = shalt.err (!%p59_p4)
}
   0xb   :  { %17 = dma.hbm_to_vmem [thread:$0]  %s106_s0, 128, %s15_s7, [#allocation3]  }
   0xc   :  { %83 = dma.done.wait [#allocation3], 128  }
   0xd   :  { %84 = vsyncadd [#allocation3], 4294967168  ;;  %v21_v0 = vld [vmem:[#allocation2] sm:$0xff]  ;;  %s88_s11 = smov 1   ;;  %s89_s12 = smov [#allocation5]  }
   0xe   :  { %22 = vrot.lane.b32.xlu0 %v21_v0, %s88_s11  ;;  %s31_s13 = sshll.u32 %s89_s12, 4  ;;  %s32_s13 = int_to_ptr.vmem [resolvable:$true] %s31_s13 }
   0xf   :  { %s63_s14 = scalar_lea.vmem %s32_s13, 128  ;;  %p68_p6 = scmp.lt.s32.totalorder %s32_s13, %s32_s13 }
  0x10   :  { %p64_p5 = scmp.ne.s32.totalorder %s32_s13, %s63_s14  ;;  %p69_p7 = scmp.lt.s32.totalorder %s63_s14, %s63_s14 }
  0x12   :  { %p70_p8 = por %p69_p7, %p68_p6 }
  0x14   :  { %p71_p9 = pnand %p70_p8, %p64_p5 }
  0x80   :  { %v23_v1 = vpop.permute.xlu0 %22 }
  0x81   :  { %24 = vst [vmem:[#allocation5] sm:$0xff] %v23_v1 }
  0x82   :  { %74 = shalt.err (!%p71_p9)
}
  0x83   :  { %34 = dma.vmem_to_hbm [thread:$0]  %s32_s13, 128, %s107_s1, [#allocation4]  }
  0x84   :  { %85 = dma.done.wait [#allocation4], 128  }
  0x85   :  { %86 = vsyncadd [#allocation4], 4294967168 }
  0x86   :  { %38 = vsyncpa [#allocation3], 1 }
  0x87   :  { %39 = vsyncpa [#allocation4], 1 }

</bundles_post_ra>
